<compile_context>
chip_gen: v7x
topology: tpu7x:2x2x1
jax: 0.10.0
libtpu: 0.0.40
codegen_flags: <defaults>
</compile_context>

<pallas_src>
import math

import jax
import jax.numpy as jnp
from jax.experimental import pallas as pl
from jax.experimental.pallas import tpu as pltpu


def _output_heads_kernel(h_ref, w_ref, b_ref, out_ref):
    # Fused MXU matmul (f32 accumulate) + f32 bias, one lane-dense store.
    out_ref[...] = (
        jnp.dot(h_ref[...], w_ref[...], preferred_element_type=jnp.float32)
        + b_ref[...]
    ).astype(out_ref.dtype)


def _round_up(x, m):
    return ((x + m - 1) // m) * m


# Sublane packing per element size (f32 -> 8, bf16 -> 16, int8/fp8 -> 32).
_SUBLANE = {4: 8, 2: 16, 1: 32}


def _vmem_plan():
    """Generation-aware VMEM budget, max row tile and compiler VMEM limit."""
    try:
        vmem = pltpu.get_tpu_info().vmem_capacity_bytes
    except Exception:  # conservative fallback if the query is unavailable
        vmem = 64 * 1024 * 1024
    if vmem >= 100 * 1024 * 1024:  # v5e / v6e class (128 MiB VMEM)
        return dict(budget=80 * 1024 * 1024, max_rows=2048,
                    limit=96 * 1024 * 1024)
    # v7x class (64 MiB per TensorCore)
    return dict(budget=40 * 1024 * 1024, max_rows=1024,
                limit=48 * 1024 * 1024)


def _choose_row_tile(m, k, n_pad, h_itemsize, out_itemsize, sublane,
                     budget, max_rows):
    """Largest sublane-aligned row tile whose working set fits the VMEM budget."""
    # Resident, single-buffered fused weight + f32 bias.
    fixed = k * n_pad * h_itemsize + n_pad * 4
    avail = budget - fixed
    per_row = 2 * (k * h_itemsize + n_pad * out_itemsize)  # double-buffered h + out
    if avail <= sublane * per_row:
        # TODO(synk): add a K-tiled f32-accumulator fallback ("arbitrary" K axis)
        # for very large K * (R + C) instead of failing.
        raise ValueError(
            f"OutputHeads fused weight ({fixed} bytes) leaves no room for row "
            f"tiling within the {budget}-byte VMEM budget; tile K instead.")
    tm = min(avail // per_row, max_rows)
    # Guarantee >= 2 grid steps so v7x's second TensorCore gets work
    # (neutral on v5e/v6e).
    tm = min(tm, _round_up(pl.cdiv(m, 2), sublane))
    tm = max(sublane, (tm // sublane) * sublane)
    return int(tm)


def prepare_fused_params(w_reg, b_reg, w_cls, b_cls, act_dtype):
    """Build the fused, lane-padded weight/bias ONCE (init-time, not per call).

    w_*: [K, out] (already transposed from nn.Linear's [out, K]); b_*: [out].
    Returns (w_fused [K, Npad] in act_dtype, b_fused [1, Npad] in f32, R, C).
    """
    R = w_reg.shape[1]
    C = w_cls.shape[1]
    N = R + C
    Npad = max(128, _round_up(N, 128))  # lane-dense output width
    w_fused = jnp.concatenate([w_reg, w_cls], axis=1)
    b_fused = jnp.concatenate([b_reg, b_cls], axis=0)[None, :]
    if Npad > N:
        w_fused = jnp.pad(w_fused, ((0, 0), (0, Npad - N)))
        b_fused = jnp.pad(b_fused, ((0, 0), (0, Npad - N)))
    # Bias stays f32: added to the f32 MXU accumulator (matches PyTorch exactly).
    return w_fused.astype(act_dtype), b_fused.astype(jnp.float32), R, C


def output_heads(h, w_fused, b_fused, R, C, out_dtype=None):
    """h: [..., K]; fused params from prepare_fused_params.  Returns (reg, cls)."""
    lead_shape = h.shape[:-1]
    K = h.shape[-1]
    M = math.prod(lead_shape) if lead_shape else 1
    N = R + C
    Npad = w_fused.shape[1]
    out_dtype = h.dtype if out_dtype is None else out_dtype

    h_itemsize = jnp.dtype(h.dtype).itemsize
    out_itemsize = jnp.dtype(out_dtype).itemsize
    sublane = _SUBLANE.get(h_itemsize, 8)

    plan = _vmem_plan()
    tm = _choose_row_tile(M, K, Npad, h_itemsize, out_itemsize, sublane,
                          plan["budget"], plan["max_rows"])

    # No row padding: ragged last block.  OOB rows of the h block are undefined
    # but each output row only depends on its own input row, and the wrapper
    # slices out[:M] below, so they are never observed.
    h2 = h.reshape(M, K)
    grid = (pl.cdiv(M, tm),)

    cost = pl.CostEstimate(
        flops=2 * M * K * N,
        transcendentals=0,
        bytes_accessed=(M * K * h_itemsize          # h read
                        + K * Npad * h_itemsize     # fused weight read
                        + Npad * 4                  # f32 bias read
                        + M * Npad * out_itemsize), # output write
    )

    def _resident_spec(block_shape):
        # Constant index_map -> keep a single buffer (no pointless double-buffer).
        try:
            return pl.BlockSpec(block_shape, lambda i: (0, 0),
                                pipeline_mode=pl.Buffered(1))
        except TypeError:
            return pl.BlockSpec(block_shape, lambda i: (0, 0))

    out = pl.pallas_call(
        _output_heads_kernel,
        out_shape=jax.ShapeDtypeStruct((M, Npad), out_dtype),
        grid=grid,
        in_specs=[
            pl.BlockSpec((tm, K), lambda i: (i, 0)),  # streamed row tiles of h
            _resident_spec((K, Npad)),                # resident fused weight
            _resident_spec((1, Npad)),                # resident f32 fused bias
        ],
        out_specs=pl.BlockSpec((tm, Npad), lambda i: (i, 0)),
        compiler_params=pltpu.CompilerParams(
            dimension_semantics=("parallel",),        # shard row tiles over v7x TCs
            vmem_limit_bytes=plan["limit"],
        ),
        cost_estimate=cost,
    )(h2, w_fused, b_fused)

    reg = out[:M, :R].reshape(*lead_shape, R)
    cls = out[:M, R:N].reshape(*lead_shape, C)
    return reg, cls


if __name__ == "__main__":
    batch, seq, in_features = 2, 8, 32
    regression_dim, classification_dim = 4, 10

    key = jax.random.PRNGKey(0)
    k_h, k_wr, k_br, k_wc, k_bc = jax.random.split(key, 5)

    h = jax.random.normal(k_h, (batch, seq, in_features), dtype=jnp.float32)

    # nn.Linear(in_features, out) -> weight [out, in], bias [out].  Deterministic
    # init mimicking PyTorch's default uniform range; pre-transpose to [in, out].
    bound = 1.0 / (in_features ** 0.5)
    w_reg_t = jax.random.uniform(k_wr, (regression_dim, in_features),
                                 minval=-bound, maxval=bound)
    b_reg = jax.random.uniform(k_br, (regression_dim,),
                               minval=-bound, maxval=bound)
    w_cls_t = jax.random.uniform(k_wc, (classification_dim, in_features),
                                 minval=-bound, maxval=bound)
    b_cls = jax.random.uniform(k_bc, (classification_dim,),
                               minval=-bound, maxval=bound)

    w_reg = w_reg_t.T  # [in, reg_dim]
    w_cls = w_cls_t.T  # [in, cls_dim]

    # Build fused params ONCE (init-time), not per forward call.
    w_fused, b_fused, R, C = prepare_fused_params(w_reg, b_reg, w_cls, b_cls,
                                                  h.dtype)
    w_fused, b_fused = jax.block_until_ready((w_fused, b_fused))

    reg_out, cls_out = output_heads(h, w_fused, b_fused, R, C)
    jax.block_until_ready((reg_out, cls_out))

    # Reference check (plain JAX).
    reg_ref = h @ w_reg + b_reg
    cls_ref = h @ w_cls + b_cls
    assert reg_out.shape == (batch, seq, regression_dim)
    assert cls_out.shape == (batch, seq, classification_dim)
    assert jnp.allclose(reg_out, reg_ref, atol=1e-5)
    assert jnp.allclose(cls_out, cls_ref, atol=1e-5)

    print("KERNEL_OK")
</pallas_src>

<mosaic_0001>
module attributes {stable_mosaic.version = 11 : i64} {
  func.func @_output_heads_kernel(%arg0: i32, %arg1: memref<8x32xf32, #tpu.memory_space<vmem>>, %arg2: memref<32x128xf32, #tpu.memory_space<vmem>>, %arg3: memref<1x128xf32, #tpu.memory_space<vmem>>, %arg4: memref<8x128xf32, #tpu.memory_space<vmem>>) attributes {dimension_semantics = [#tpu.dimension_semantics<parallel>], iteration_bounds = array<i64: 2>, scalar_prefetch = 0 : i64, scratch_operands = 0 : i64, tpu.core_type = #tpu.core_type<tc>, window_params = [{transform_indices = @transform_0, window_bounds = array<i64: 8, 32>}, {pipeline_mode = #tpu.pipeline_mode<synchronous>, transform_indices = @transform_1, window_bounds = array<i64: 32, 128>}, {pipeline_mode = #tpu.pipeline_mode<synchronous>, transform_indices = @transform_2, window_bounds = array<i64: 1, 128>}, {transform_indices = @transform_3, window_bounds = array<i64: 8, 128>}]} {
    %c0 = arith.constant 0 : index
    %c0_0 = arith.constant 0 : index
    %0 = vector.load %arg1[%c0, %c0_0] : memref<8x32xf32, #tpu.memory_space<vmem>>, vector<8x32xf32>
    %c0_1 = arith.constant 0 : index
    %c0_2 = arith.constant 0 : index
    %1 = vector.load %arg2[%c0_1, %c0_2] : memref<32x128xf32, #tpu.memory_space<vmem>>, vector<32x128xf32>
    %cst = arith.constant dense<0.000000e+00> : vector<8x128xf32>
    %2 = tpu.matmul %0, %1, %cst {dimension_numbers = #tpu.dot_dimension_numbers<[1], [0], [0], [1], [0, 0, 1, 1], [], []>} : vector<8x32xf32>, vector<32x128xf32>, vector<8x128xf32> -> vector<8x128xf32>
    %c0_3 = arith.constant 0 : index
    %c0_4 = arith.constant 0 : index
    %3 = vector.load %arg3[%c0_3, %c0_4] : memref<1x128xf32, #tpu.memory_space<vmem>>, vector<1x128xf32>
    %4 = vector.broadcast %3 : vector<1x128xf32> to vector<8x128xf32>
    %5 = arith.addf %2, %4 : vector<8x128xf32>
    %c0_5 = arith.constant 0 : index
    %c0_6 = arith.constant 0 : index
    %6 = vector.load %arg4[%c0_5, %c0_6] : memref<8x128xf32, #tpu.memory_space<vmem>>, vector<8x128xf32>
    tpu.vector_store %arg4[%c0_5, %c0_6], %5 {strides = array<i32>} : memref<8x128xf32, #tpu.memory_space<vmem>>, vector<8x128xf32>,
    return
  }
  func.func @transform_0(%arg0: i32) -> (i32, i32) {
    %c0_i32 = arith.constant 0 : i32
    %c0_i32_0 = arith.constant 0 : i32
    return %arg0, %c0_i32 : i32, i32
  }
  func.func @transform_1(%arg0: i32) -> (i32, i32) {
    %c0_i32 = arith.constant 0 : i32
    %c0_i32_0 = arith.constant 0 : i32
    %c0_i32_1 = arith.constant 0 : i32
    return %c0_i32, %c0_i32_0 : i32, i32
  }
  func.func @transform_2(%arg0: i32) -> (i32, i32) {
    %c0_i32 = arith.constant 0 : i32
    %c0_i32_0 = arith.constant 0 : i32
    %c0_i32_1 = arith.constant 0 : i32
    return %c0_i32, %c0_i32_0 : i32, i32
  }
  func.func @transform_3(%arg0: i32) -> (i32, i32) {
    %c0_i32 = arith.constant 0 : i32
    %c0_i32_0 = arith.constant 0 : i32
    return %arg0, %c0_i32 : i32, i32
  }
}

</mosaic_0001>

<bundles_post_ra>
// kernel: tpu_custom_call.1
= control target key start
LH: loop header
LB: loop body
LE: loop exit
PB: predicated region body
PF: predicated region fallthrough
CT: control target
= control target key end

     0   :  { %8 = vsyncpa [#allocation3], 0  ;;  %s839_s0 = inlined_call_operand.hbm [shape: f32[16,32], index: 0, kind: input, shape index: {}]   ;;  %s840_s1 = inlined_call_operand.hbm [shape: f32[32,128], index: 1, kind: input, shape index: {}]   ;;  %s841_s2 = inlined_call_operand.vmem [shape: f32[1,128], index: 2, kind: input, shape index: {}]   ;;  %s842_s3 = inlined_call_operand.hbm [shape: f32[16,128], index: 3, kind: output, shape index: {}]  }
   0x1   :  { %10 = vsyncpa [#allocation3 + $0x1], 0 }
   0x2   :  { %11 = vsyncpa [#allocation6], 0 }
   0x3   :  { %12 = vsyncpa [#allocation4], 0 }
   0x4   :  { %14 = vsyncpa [#allocation4 + $0x1], 0  ;;  %s640_s12 = smov 0   ;;  %s642_s13 = smov 0  }
   0x5   :  { %s644_s14 = smov 0   ;;  %s646_s15 = smov 0  }
   0x6 LB: > { %s661_s16 = sadd.s32 4294967295, %s610_s15   ;;  %s382_s17 = sadd.s32 4294967294, %s610_s15   ;;  %s610_s15 = sphi %s646_s15, %s862_s15   ;;  %s606_s14 = sphi %s644_s14, %s861_s14   ;;  %s602_s13 = sphi %s642_s13, %s860_s13   ;;  %s598_s12 = sphi %s640_s12, %s859_s12  }
   0x7   : > { %p40_p0 = scmp.ne.s32.totalorder %s602_s13, %s598_s12  ;;  %p843_p1 = scmp.eq.s32.totalorder %s661_s16, 0 }
   0x8   : > { %p112_p3 = scmp.eq.s32.totalorder %s382_s17, 1  ;;  %p383_p5 = scmp.ge.s32.totalorder %s610_s15, 1 }
   0x9   : > { %p670_p4 = por %p843_p1, %p40_p0  ;;  %p119_p7 = scmp.lt.s32.totalorder %s610_s15, 3 }
   0xa   : > { %p675_p6 = por %p112_p3, %p40_p0  ;;  %s612_s21 = smov [#allocation5]  }
   0xb   : > { %s846_s18 = scalar_select %p670_p4, 1, 0 }
   0xc   : > { %s847_s19 = scalar_select %p675_p6, 1, 0 }
   0xd   : > { %p680_p8 = pnand %p383_p5, %p119_p7  ;;  %s131_s22 = sshll.u32 %s612_s21, 4  ;;  %s684_s22 = int_to_ptr.vmem [resolvable:$true] %s131_s22 }
   0xe   : > { %s696_s24 = sadd.s32 1, %s610_s15   ;;  %s27_s25 = sadd.s32 1, %s606_s14 }
   0xf   : > { %s848_s20 = scalar_select %p680_p8, 1, 0 }
  0x10   : > { %p428_p9 = pneg %p680_p8  ;;  %s24_s26 = ssub.s32 %s610_s15, %s696_s24 }
  0x11   : > { %s482_s29 = scalar_lea.hbm %s840_s1, 512 }
  0x12   : > { %p691_p11 = pnand %p428_p9, %p843_p1  ;;  %p483_p12 = scmp.ne.s32.totalorder %s840_s1, %s482_s29 }
  0x13   : > { %p489_p5 = scmp.lt.u32.totalorder %s482_s29, %s840_s1 }
  0x14   : > { %p484_p13 = pneg %p691_p11 }
  0x16   : > { %p485_p0 = pnand %p484_p13, %p483_p12 }
  0x18   : > { %p486_p3 = pneg %p485_p0 }
  0x1a   : > { %p491_p7 = pnand %p489_p5, %p486_p3 }
  0x1c   : > { %494 = shalt.err (!%p491_p7)
}
  0x1d   : > { %s495_s7 = scalar_lea.vmem %s684_s22, 512  ;;  %p503_p2 = scmp.lt.s32.totalorder %s684_s22, %s684_s22 }
  0x1e   : > { %p496_p9 = scmp.ne.s32.totalorder %s684_s22, %s495_s7  ;;  %p504_p6 = scmp.lt.s32.totalorder %s495_s7, %s495_s7 }
  0x20   : > { %p498_p10 = pnand %p496_p9, %p484_p13  ;;  %p505_p4 = por %p504_p6, %p503_p2 }
  0x22   : > { %p499_p1 = pneg %p498_p10 }
  0x24   : > { %p506_p8 = pnand %p505_p4, %p499_p1 }
  0x26   : > { %509 = shalt.err (!%p506_p8)
}
  0x27   : > { %s613_s8 = smov 128   ;;  %s614_s9 = smov 8  }
  0x28   : > { %431 = dma.hbm_to_vmem [thread:$0]  (!%p691_p11), %s840_s1, 512, %s684_s22, [#allocation6], %s613_s8, %s613_s8, %s614_s9  }
  0x29   : > { %p25_p2 = scmp.eq.s32.totalorder %s24_s26, 0  ;;  %p34_p1 = scmp.ne.s32.totalorder %s606_s14, %s602_s13 }
  0x2a   : > { %p35_p4 = scmp.eq.s32.totalorder %s610_s15, 0  ;;  %p441_p6 = scmp.lt.s32.totalorder %s610_s15, 2 }
  0x2b   : > { %s727_s17 = scalar_select %p25_p2, %s606_s14, %s27_s25  }
  0x2c   : > { %p36_p8 = por %p35_p4, %p34_p1  ;;  %p850_p10 = scmp.eq.s32.totalorder %s661_s16, 1 }
  0x2d   : > { %s148_s27 = sand.u32 1, %s606_s14   ;;  %s387_s28 = sshll.u32 %s610_s15, 7 }
  0x2e   : > { %p731_p12 = por %p850_p10, %p34_p1  ;;  %s386_s29 = sshll.u32 %s148_s27, 3 }
  0x2f   : > { %s740_s4 = scalar_lea.hbm %s839_s0, %s387_s28  ;;  %s152_s22 = scalar_lea.vmem [#allocation2], %s386_s29 }
  0x30   : > { %s159_s25 = sshll.u32 %s152_s22, 4  ;;  %p742_p11 = pnand %p441_p6, %p36_p8  ;;  %s746_s25 = int_to_ptr.vmem [resolvable:$true] %s159_s25 }
  0x31   : > { %s149_s5 = scalar_lea.sflag [#allocation3], %s148_s27  ;;  %s510_s6 = scalar_lea.hbm %s740_s4, 128 }
  0x32   : > { %p511_p13 = scmp.ne.s32.totalorder %s740_s4, %s510_s6  ;;  %p512_p0 = pneg %p742_p11 }
  0x33   : > { %s515_s9 = scalar_lea.hbm %s839_s0, 256  ;;  %p516_p7 = scmp.lt.u32.totalorder %s740_s4, %s839_s0 }
  0x34   : > { %p513_p3 = pnand %p512_p0, %p511_p13  ;;  %p517_p9 = scmp.lt.u32.totalorder %s515_s9, %s510_s6 }
  0x35   : > { %p519_p1 = scmp.lt.u32.totalorder %s510_s6, %s740_s4 }
  0x36   : > { %p514_p5 = pneg %p513_p3  ;;  %p518_p2 = por %p517_p9, %p516_p7 }
  0x38   : > { %p520_p4 = por %p519_p1, %p518_p2 }
  0x3a   : > { %p521_p6 = pnand %p520_p4, %p514_p5 }
  0x3c   : > { %524 = shalt.err (!%p521_p6)
}
  0x3d   : > { %s525_s27 = scalar_lea.vmem %s746_s25, 128  ;;  %s615_s28 = smov [#allocation2]  }
  0x3e   : > { %p526_p8 = scmp.ne.s32.totalorder %s746_s25, %s525_s27  ;;  %s530_s29 = sshll.u32 %s615_s28, 4  ;;  %s531_s29 = int_to_ptr.vmem [resolvable:$false] %s530_s29 }
  0x3f   : > { %s532_s23 = scalar_lea.vmem %s531_s29, 256  ;;  %p533_p3 = scmp.lt.s32.totalorder %s746_s25, %s531_s29 }
  0x40   : > { %p528_p10 = pnand %p526_p8, %p512_p0  ;;  %p534_p7 = scmp.lt.s32.totalorder %s532_s23, %s525_s27 }
  0x42   : > { %p529_p13 = pneg %p528_p10  ;;  %p535_p9 = por %p534_p7, %p533_p3 }
  0x44   : > { %p536_p2 = pnand %p535_p9, %p529_p13 }
  0x46   : > { %539 = shalt.err (!%p536_p2)
}
  0x47   : > { %435 = dma.hbm_to_vmem [thread:$0]  (!%p742_p11), %s740_s4, 128, %s746_s25, %s149_s5  }
  0x48   : > { %p853_p5 = scmp.ne.s32.totalorder %s848_s20, 0 }
  0x49   : > { %s776_s30 = sand.u32 (!%p853_p5), 1, %s602_s13   ;;  %p854_p0 = scmp.ne.s32.totalorder (!%p853_p5), %s846_s18, 0 }
  0x4a   : > { %168 = sbr.rel (%p853_p5) target bundleno = 323 (0x143), region = 32  ;;  %s389_s22 = sshll.u32 (!%p853_p5), %s776_s30, 3 }
  0x4b   : > { %s171_s6 = scalar_lea.sflag (!%p853_p5), [#allocation3], %s776_s30  ;;  %s174_s7 = scalar_lea.vmem (!%p853_p5), [#allocation2], %s389_s22 }
  0x51   : > { %585 = dma.done.wait (%p854_p0), %s171_s6, 128  }
  0x52   : > { %587 = vsyncadd (%p854_p0), %s171_s6, 4294967168  ;;  %p855_p1 = scmp.eq.s32.totalorder %s661_s16, 0 }
  0x54   : > { %589 = dma.done.wait (%p855_p1), [#allocation6], 512   ;;  %p856_p11 = pmov %p855_p1 }
  0x55   : > { %v616_v0 = vmov 0.0|0.0   ;;  %vm617_vm0 = vmmov 0   ;;  %v618_v1 = vmov 0.0   ;;  %v202_v2 = vld [vmem:[#allocation5] sm:$0xff]  ;;  %v203_v3 = vld [vmem:[#allocation5 + $0x8] sm:$0xff]  ;;  %v204_v4 = vld [vmem:[#allocation5 + $0x10] sm:$0xff] }
  0x56   : > { %591 = vsyncadd (%p856_p11), [#allocation6], 4294966784  ;;  %414 = vmatprep.subr.bf16.mxu0 %v616_v0  ;;  %411 = vmatprep.mubr.msk.f32.mxu0 %vm617_vm0, %v618_v1  ;;  %v415_v5 = vpack.c.bf16 %v203_v3, %v202_v2  ;;  %v205_v6 = vld [vmem:[#allocation5 + $0x18] sm:$0xff]  ;;  %vm213_vm1 = vcmask 261120   ;;  %v392_v9 = vld [vmem:[%s841_s2] ss:$0 sm:$0xff] }
  0x57   : > { %v418_v7 = vpack.c.bf16 %v205_v6, %v204_v4  ;;  %v201_v8 = vld [vmem:[%s174_s7] sm:$0xff]  ;;  %s395_s4 = sshll.u32 %s661_s16, 7  ;;  %s200_s25 = scalar_lea.vmem [#allocation7], %s389_s22 }
  0x58   : > { %416 = vmatpush3.bf16.msra.mxu0 %v415_v5  ;;  %s302_s26 = sshll.u32 %s200_s25, 4  ;;  %s795_s9 = scalar_lea.hbm %s842_s3, %s395_s4  ;;  %s797_s26 = int_to_ptr.vmem [resolvable:$true] %s302_s26 }
  0x59   : > { %417 = vmatprep.subr.bf16.mxu0 %v616_v0  ;;  %s289_s10 = scalar_lea.sflag [#allocation4], %s776_s30  ;;  %s540_s11 = scalar_lea.vmem %s797_s26, 128 }
  0x5a   : > { %p541_p4 = scmp.ne.s32.totalorder %s797_s26, %s540_s11  ;;  %s619_s16 = smov [#allocation7]  }
  0x5b   : > { %s544_s27 = sshll.u32 %s619_s16, 4  ;;  %s545_s27 = int_to_ptr.vmem [resolvable:$false] %s544_s27 }
  0x5c   : > { %419 = vmatpush3.bf16.msra.mxu0 %v418_v7  ;;  %p542_p6 = pnand %p541_p4, %p731_p12  ;;  %s546_s28 = scalar_lea.vmem %s545_s27, 256 }
  0x5d   : > { %p547_p10 = scmp.lt.s32.totalorder %s797_s26, %s545_s27  ;;  %p548_p13 = scmp.lt.s32.totalorder %s546_s28, %s540_s11 }
  0x5e   : > { %p543_p8 = pneg %p542_p6 }
  0x5f   : > { %412 = vmatmul.mubr.msk.f32.vlgmr.msra.gmra.mrb[0].mxu0 %vm213_vm1, %v201_v8  ;;  %p549_p3 = por %p548_p13, %p547_p10 }
  0x61   : > { %p550_p7 = pnand %p549_p3, %p543_p8 }
 0x132   : > { %v283_v10 = vpop.f32.mrb[0].mxu0 }
 0x133   : > { %v284_v11 = vadd.f32 %v392_v9, %v283_v10  ;;  %v413_v12 = vpop.f32.mrb[1].mxu0 }
 0x135   : > { %287 = vst [vmem:[%s200_s25] sm:$0xff] %v284_v11 }
 0x136   : > { %553 = shalt.err (!%p550_p7)
}
 0x137   : > { %s554_s29 = scalar_lea.hbm %s795_s9, 128  ;;  %s558_s22 = scalar_lea.hbm %s842_s3, 256 }
 0x138   : > { %p555_p9 = scmp.ne.s32.totalorder %s795_s9, %s554_s29  ;;  %p559_p0 = scmp.lt.u32.totalorder %s795_s9, %s842_s3 }
 0x139   : > { %p560_p1 = scmp.lt.u32.totalorder %s558_s22, %s554_s29  ;;  %p562_p4 = scmp.lt.u32.totalorder %s554_s29, %s795_s9 }
 0x13a   : > { %p556_p2 = pnand %p555_p9, %p731_p12 }
 0x13b   : > { %p561_p11 = por %p560_p1, %p559_p0 }
 0x13c   : > { %p557_p5 = pneg %p556_p2 }
 0x13d   : > { %p563_p6 = por %p562_p4, %p561_p11 }
 0x13f   : > { %p564_p8 = pnand %p563_p6, %p557_p5 }
 0x141   : > { %567 = shalt.err (!%p564_p8)
}
 0x142   : > { %426 = dma.vmem_to_hbm [thread:$0]  (%p731_p12), %s797_s26, 128, %s795_s9, %s289_s10  }
 0x143 PF: > { %s314_s18 = sand.u32 1, %s598_s12   ;;  %p857_p10 = scmp.ne.s32.totalorder %s847_s19, 0 }
 0x144   : > { %p858_p13 = scmp.ge.s32.totalorder %s610_s15, 2  ;;  %s315_s20 = scalar_lea.sflag [#allocation4], %s314_s18 }
 0x146   : > { %p437_p3 = pnand %p858_p13, %p857_p10 }
 0x148   : > { %593 = dma.done.wait (!%p437_p3), %s315_s20, 128  }
 0x149   : > { %595 = vsyncadd (!%p437_p3), %s315_s20, 4294967168  ;;  %p17_p7 = scmp.ge.s32.totalorder %s696_s24, 4   ;;  %s859_s12 = smov %s602_s13 }
 0x14a   : > { %s860_s13 = smov %s606_s14  ;;  %s861_s14 = smov %s727_s17 }
 0x14b   : > { %s862_s15 = smov %s696_s24  ;;  %19 = sbr.rel (!%p17_p7) target bundleno = 6 (0x6), region = 81 }
 0x152   :  { %320 = vsyncpa [#allocation3], 1 }
 0x153   :  { %322 = vsyncpa [#allocation3 + $0x1], 1 }
 0x154   :  { %323 = vsyncpa [#allocation6], 1 }
 0x155   :  { %324 = vsyncpa [#allocation4], 1 }
 0x156   :  { %326 = vsyncpa [#allocation4 + $0x1], 1 }

</bundles_post_ra>
